<compile_context>
chip_gen: v6e
topology: v6e:2x2x1
jax: 0.10.0
libtpu: 0.0.40
codegen_flags: <defaults>
</compile_context>

<pallas_src>
import functools

import jax
import jax.numpy as jnp
from jax.experimental import pallas as pl
from jax.experimental.pallas import tpu as pltpu


# Lane-tile width for the flattened index axis.  Sized so that the per-step
# working set (int32 idx tile + f32 one-hot (E, TILE_N) + f32 out tile, all
# double-buffered) stays comfortably inside v7x's scoped VMEM while still
# being large enough to amortize the ~0.35 us/step pipeline overhead.
TILE_N = 2048


# ---------------------------------------------------------------------------
# Kernel: gather-by-one-hot-matmul over one lane tile of indices
# ---------------------------------------------------------------------------
def _rpe_gather_kernel(table_ref, idx_ref, out_ref):
    # table_ref : (H_pad, E)   float32 bias table (heads padded to sublane mult.)
    # idx_ref   : (1, Tn)      int32 flattened indices, values in [0, E)
    # out_ref   : (H_pad, Tn)  out[h, n] = table[h, idx[n]]
    E = table_ref.shape[1]
    idx = idx_ref[...]                                         # (1, Tn)
    e_iota = jax.lax.broadcasted_iota(jnp.int32, (E, 1), 0)    # (E, 1)
    onehot = (e_iota == idx).astype(table_ref.dtype)           # (E, Tn) via bcast
    out_ref[...] = jnp.dot(
        table_ref[...], onehot, preferred_element_type=jnp.float32
    ).astype(out_ref.dtype)


def _cost(h_pad, e, n_pad):
    return pl.CostEstimate(
        flops=2 * h_pad * e * n_pad,
        transcendentals=0,
        bytes_accessed=4 * (h_pad * e + n_pad + h_pad * n_pad),
    )


@functools.partial(jax.jit, static_argnames=())
def relative_position_2d_encoder_forward(table, attn_rpe_index):
    """table: (num_heads, embed_size); attn_rpe_index: int array of any shape.
    Returns (1, num_heads, *attn_rpe_index.shape), matching the PyTorch module.
    Note: like the PyTorch module, indices are assumed to be in [0, embed_size)."""
    H, E = table.shape
    idx_shape = attn_rpe_index.shape
    idx_flat = attn_rpe_index.reshape(-1).astype(jnp.int32)
    N = idx_flat.shape[0]

    # Pad heads to a full sublane group so the output store is unmasked.
    H_pad = max(8, ((H + 7) // 8) * 8)
    table_p = table if H_pad == H else jnp.pad(table, ((0, H_pad - H), (0, 0)))

    if N <= TILE_N:
        # --- single-tile path: no grid, no auto-pipeline machinery -----------
        N_pad = max(128, ((N + 127) // 128) * 128)
        if N_pad != N:
            idx_flat = jnp.pad(idx_flat, (0, N_pad - N))
        idx_2d = idx_flat.reshape(1, N_pad)

        out = pl.pallas_call(
            _rpe_gather_kernel,
            out_shape=jax.ShapeDtypeStruct((H_pad, N_pad), table.dtype),
            in_specs=[
                pl.BlockSpec(memory_space=pltpu.MemorySpace.VMEM),
                pl.BlockSpec(memory_space=pltpu.MemorySpace.VMEM),
            ],
            out_specs=pl.BlockSpec(memory_space=pltpu.MemorySpace.VMEM),
            cost_estimate=_cost(H_pad, E, N_pad),
        )(table_p, idx_2d)
    else:
        # --- tiled path: N split over a "parallel" grid axis ------------------
        num_tiles = pl.cdiv(N, TILE_N)
        N_pad = num_tiles * TILE_N
        if N_pad != N:
            idx_flat = jnp.pad(idx_flat, (0, N_pad - N))
        idx_2d = idx_flat.reshape(1, N_pad)

        out = pl.pallas_call(
            _rpe_gather_kernel,
            out_shape=jax.ShapeDtypeStruct((H_pad, N_pad), table.dtype),
            grid=(num_tiles,),
            in_specs=[
                pl.BlockSpec((H_pad, E), lambda i: (0, 0)),      # table resident
                pl.BlockSpec((1, TILE_N), lambda i: (0, i)),     # idx tile
            ],
            out_specs=pl.BlockSpec((H_pad, TILE_N), lambda i: (0, i)),
            compiler_params=pltpu.CompilerParams(
                dimension_semantics=("parallel",)),
            cost_estimate=_cost(H_pad, E, N_pad),
        )(table_p, idx_2d)

    return out[:H, :N].reshape((1, H) + idx_shape)


# ---------------------------------------------------------------------------
# Pure-JAX reference
# ---------------------------------------------------------------------------
def reference_forward(table, attn_rpe_index):
    # table[:, idx].unsqueeze(0)
    return jnp.take(table, attn_rpe_index, axis=1)[None]


if __name__ == "__main__":
    key = jax.random.PRNGKey(0)
    NUM_HEADS, EMBED_SIZE = 4, 32        # small shapes: num_heads=4, embed_size=32

    k_tbl, k_idx1, k_idx2 = jax.random.split(key, 3)
    # trunc_normal_(std=0.02) parameter init approximated by a plain normal;
    # the init distribution is irrelevant to the forward-pass semantics.
    table = 0.02 * jax.random.normal(k_tbl, (NUM_HEADS, EMBED_SIZE), jnp.float32)

    # --- single-tile (no-grid) path: (16, 16) index grid, N = 256 ------------
    idx_small = jax.random.randint(k_idx1, (16, 16), 0, EMBED_SIZE, jnp.int32)
    out_small = jax.block_until_ready(
        relative_position_2d_encoder_forward(table, idx_small))
    ref_small = reference_forward(table, idx_small)
    assert out_small.shape == (1, NUM_HEADS, 16, 16), out_small.shape
    assert jnp.allclose(out_small, ref_small, atol=1e-6, rtol=1e-6)

    # --- tiled (grid) path: (64, 64) index grid, N = 4096 > TILE_N -----------
    idx_large = jax.random.randint(k_idx2, (64, 64), 0, EMBED_SIZE, jnp.int32)
    out_large = jax.block_until_ready(
        relative_position_2d_encoder_forward(table, idx_large))
    ref_large = reference_forward(table, idx_large)
    assert out_large.shape == (1, NUM_HEADS, 64, 64), out_large.shape
    assert jnp.allclose(out_large, ref_large, atol=1e-6, rtol=1e-6)

    print("KERNEL_OK")
</pallas_src>

<mosaic_0001>
module attributes {stable_mosaic.version = 11 : i64} {
  func.func @_rpe_gather_kernel(%arg0: memref<8x32xf32, #tpu.memory_space<vmem>>, %arg1: memref<1x256xi32, #tpu.memory_space<vmem>>, %arg2: memref<8x256xf32, #tpu.memory_space<vmem>>) attributes {dimension_semantics = [], scalar_prefetch = 0 : i64, scratch_operands = 0 : i64, tpu.core_type = #tpu.core_type<tc>} {
    %c0 = arith.constant 0 : index
    %c0_0 = arith.constant 0 : index
    %0 = vector.load %arg1[%c0, %c0_0] : memref<1x256xi32, #tpu.memory_space<vmem>>, vector<1x256xi32>
    %1 = tpu.iota {dimensions = array<i32: 0>} : vector<32x1xi32>
    %2 = vector.broadcast %1 : vector<32x1xi32> to vector<32x256xi32>
    %3 = vector.broadcast %0 : vector<1x256xi32> to vector<32x256xi32>
    %4 = arith.cmpi eq, %2, %3 : vector<32x256xi32>
    %5 = arith.extui %4 : vector<32x256xi1> to vector<32x256xi32>
    %6 = arith.sitofp %5 : vector<32x256xi32> to vector<32x256xf32>
    %c0_1 = arith.constant 0 : index
    %c0_2 = arith.constant 0 : index
    %7 = vector.load %arg0[%c0_1, %c0_2] : memref<8x32xf32, #tpu.memory_space<vmem>>, vector<8x32xf32>
    %cst = arith.constant dense<0.000000e+00> : vector<8x256xf32>
    %8 = tpu.matmul %7, %6, %cst {dimension_numbers = #tpu.dot_dimension_numbers<[1], [0], [0], [1], [0, 0, 1, 1], [], []>} : vector<8x32xf32>, vector<32x256xf32>, vector<8x256xf32> -> vector<8x256xf32>
    %c0_3 = arith.constant 0 : index
    %c0_4 = arith.constant 0 : index
    %9 = vector.load %arg2[%c0_3, %c0_4] : memref<8x256xf32, #tpu.memory_space<vmem>>, vector<8x256xf32>
    tpu.vector_store %arg2[%c0_3, %c0_4], %8 {strides = array<i32>} : memref<8x256xf32, #tpu.memory_space<vmem>>, vector<8x256xf32>,
    return
  }
}

</mosaic_0001>

<bundles_post_ra>
// kernel: relative_position_2d_encoder_forward.1
= control target key start
LH: loop header
LB: loop body
LE: loop exit
PB: predicated region body
PF: predicated region fallthrough
CT: control target
= control target key end

     0   :  { %v12_v0 = vlaneseq  ;;  %v150_v1 = vmov 0.0   ;;  %v151_v11 = vmov 1.0   ;;  %vm50_vm8 = vcmask 261120   ;;  %s179_s1 = inlined_call_operand.vmem [shape: s32[1,256], index: 1, kind: input, shape index: {}]   ;;  %s180_s0 = inlined_call_operand.vmem [shape: f32[8,32], index: 0, kind: input, shape index: {}]   ;;  %s181_s2 = inlined_call_operand.vmem [shape: f32[8,256], index: 2, kind: output, shape index: {}]  }
   0x1   :  { %118 = vmatprep.mubr.f32.mxu0 %v150_v1  ;;  %v11_v3 = vld [vmem:[%s179_s1] sm:$0x3] }
   0x2   :  { %v13_v2 = vshrl.u32 %v12_v0, 7  ;;  %v49_v12 = vld [vmem:[%s180_s0] sm:$0xff] }
   0x4   :  { %v16_v4 = vadd.s32 24, %v13_v2  ;;  %v23_v5 = vsub.s32 1, %v13_v2  ;;  %v19_v6 = vsub.s32 0, %v13_v2  ;;  %v15_v7 = vadd.s32 16, %v13_v2 }
   0x5   :  { %v14_v10 = vadd.s32 8, %v13_v2 }
   0x6   :  { %v24_v8 = vrot.slane %v11_v3, %v23_v5  ;;  %v20_v9 = vrot.slane %v11_v3, %v19_v6 }
   0x8   :  { %vm32_vm0 = vcmp.eq.s32.totalorder %v16_v4, %v24_v8  ;;  %vm31_vm1 = vcmp.eq.s32.totalorder %v16_v4, %v20_v9  ;;  %vm30_vm2 = vcmp.eq.s32.totalorder %v15_v7, %v24_v8  ;;  %vm29_vm3 = vcmp.eq.s32.totalorder %v15_v7, %v20_v9 }
   0x9   :  { %139 = vmatprep.subr.msk.mxu0 %vm32_vm0, %v151_v11  ;;  %vm28_vm4 = vcmp.eq.s32.totalorder %v14_v10, %v24_v8  ;;  %vm27_vm5 = vcmp.eq.s32.totalorder %v14_v10, %v20_v9  ;;  %vm26_vm6 = vcmp.eq.s32.totalorder %v13_v2, %v24_v8  ;;  %vm25_vm7 = vcmp.eq.s32.totalorder %v13_v2, %v20_v9 }
   0xa   :  { %140 = vmatpush1.msk.msra.mxu0 %vm31_vm1, %v151_v11 }
   0xb   :  { %141 = vmatprep.subr.msk.mxu0 %vm30_vm2, %v151_v11 }
   0xc   :  { %142 = vmatpush1.msk.msra.mxu0 %vm29_vm3, %v151_v11 }
   0xd   :  { %143 = vmatprep.subr.msk.mxu0 %vm28_vm4, %v151_v11 }
   0xe   :  { %144 = vmatpush1.msk.msra.mxu0 %vm27_vm5, %v151_v11 }
   0xf   :  { %145 = vmatprep.subr.msk.mxu0 %vm26_vm6, %v151_v11 }
  0x10   :  { %146 = vmatpush1.msk.msra.mxu0 %vm25_vm7, %v151_v11 }
  0x11   :  { %147 = vmatmul.mubr.msk.f32.vlgmr.msra.gmra.mxu0 %vm50_vm8, %v49_v12 }
  0xd1   :  { %v120_v13 = vpop.f32.mrf.mxu0 }
  0xd2   :  { %125 = vst [vmem:[%s181_s2] sm:$0xff] %v120_v13 }
  0xd3   :  { %v122_v14 = vpop.f32.mrf.mxu0 }
  0xd4   :  { %126 = vst [vmem:[%s181_s2 + $0x8] sm:$0xff] %v122_v14 }

</bundles_post_ra>
